<compile_context>
chip_gen: v5e
topology: v5e:2x2
jax: 0.10.0
libtpu: 0.0.40
codegen_flags: <defaults>
</compile_context>

<pallas_src>
import jax
import jax.numpy as jnp
from jax.experimental import pallas as pl
from jax.experimental.pallas import tpu as pltpu


def _logreg_kernel(x_ref, w_ref, b_ref, o_ref):
    """One grid step processes a (Bt,)-chunk of the batch.

    x_ref: (Bt, N, D_in)        per-step tile
    w_ref: (Bt, D_out_p, D_in)  per-step tile (D_out padded to 128 lanes)
    b_ref: (Bt, 1, D_out_p)     per-step tile
    o_ref: (Bt, N, D_out_p)     lane-dense (multiple-of-128) output tile
    """
    # Batched MXU matmul, contracting on D_in of *both* operands:
    # no in-kernel `w.T` (no XLU transpose / relayout before the MXU push).
    s = jnp.einsum(
        "bnd,bod->bno", x_ref[...], w_ref[...],
        preferred_element_type=jnp.float32)              # (Bt, N, D_out_p) f32

    # Bias broadcast over the N (sublane) axis.
    s = s + b_ref[...]                                   # (Bt, 1, D_out_p)

    # Sigmoid: exp runs on the EUP; exact reciprocal (kernel is HBM / step-
    # overhead bound, so approx=True would buy nothing and costs accuracy).
    o_ref[...] = pl.reciprocal(1.0 + jnp.exp(-s), approx=False).astype(o_ref.dtype)


def _choose_block_b(B, N, d_in, d_out_p, budget_bytes=8 * 1024 * 1024):
    """Batch tile: as large as the VMEM budget allows, but keep >=2 grid steps
    (v7x has 2 TensorCores sharing the 'parallel' batch axis)."""
    bytes_per_sample = 4 * (N * d_in + d_out_p * d_in + d_out_p + N * d_out_p)  # f32
    bt = max(1, budget_bytes // (2 * bytes_per_sample))  # 2x: double-buffering
    bt = min(bt, 64)                                     # diminishing returns
    if B >= 2:
        bt = min(bt, max(1, B // 2))                     # keep grid >= 2 steps
    return int(max(1, min(bt, B)))


def logistic_regression_forward(params, x, input_dim, output_dim, *, block_b=None):
    """params: (B, nparams) float32, x: (B, N, input_dim) float32."""
    B, N, d_in = x.shape
    assert d_in == input_dim
    n_w = output_dim * input_dim

    # ---- plain-JAX glue: unpack flat params (weight first, then bias) ----
    w = params[:, :n_w].reshape(B, output_dim, input_dim)
    b = params[:, n_w:n_w + output_dim]

    # ---- lane-dense output: pad D_out up to a multiple of 128 ----
    d_out_p = ((output_dim + 127) // 128) * 128
    pad_o = d_out_p - output_dim
    if pad_o:
        w = jnp.pad(w, ((0, 0), (0, pad_o), (0, 0)))
        b = jnp.pad(b, ((0, 0), (0, pad_o)))
    b = b[:, None, :]                                    # (B, 1, d_out_p)

    # ---- batch tiling ----
    if block_b is None:
        block_b = _choose_block_b(B, N, d_in, d_out_p)
    block_b = max(1, min(block_b, B))
    n_steps = pl.cdiv(B, block_b)
    b_pad = n_steps * block_b
    if b_pad != B:
        x = jnp.pad(x, ((0, b_pad - B), (0, 0), (0, 0)))
        w = jnp.pad(w, ((0, b_pad - B), (0, 0), (0, 0)))
        b = jnp.pad(b, ((0, b_pad - B), (0, 0), (0, 0)))

    out = pl.pallas_call(
        _logreg_kernel,
        out_shape=jax.ShapeDtypeStruct((b_pad, N, d_out_p), x.dtype),
        grid_spec=pltpu.PrefetchScalarGridSpec(
            num_scalar_prefetch=0,
            grid=(n_steps,),
            in_specs=[
                pl.BlockSpec((block_b, N, d_in), lambda i: (i, 0, 0)),
                pl.BlockSpec((block_b, d_out_p, d_in), lambda i: (i, 0, 0)),
                pl.BlockSpec((block_b, 1, d_out_p), lambda i: (i, 0, 0)),
            ],
            out_specs=pl.BlockSpec((block_b, N, d_out_p), lambda i: (i, 0, 0)),
        ),
        compiler_params=pltpu.CompilerParams(
            dimension_semantics=("parallel",)),
    )(x, w, b)

    # Strip batch padding and the lane padding of the output dim.
    return out[:B, :, :output_dim]


def reference_forward(params, x, input_dim, output_dim):
    B = x.shape[0]
    n_w = output_dim * input_dim
    w = params[:, :n_w].reshape(B, output_dim, input_dim)
    b = params[:, n_w:n_w + output_dim]
    s = jnp.einsum("bnd,bod->bno", x, w) + b[:, None, :]
    return jax.nn.sigmoid(s)


if __name__ == "__main__":
    # Small shapes consistent with the module's forward.
    B = 2            # batch of parameter-sets / inputs
    N = 8            # sequence / rows per sample
    input_dim = 32
    output_dim = 8
    nparams = output_dim * input_dim + output_dim

    key = jax.random.PRNGKey(0)
    k1, k2 = jax.random.split(key)
    # Deterministic init: params ~ U(-1/sqrt(in), 1/sqrt(in)) like nn.Linear.
    bound = 1.0 / (input_dim ** 0.5)
    params = jax.random.uniform(k1, (B, nparams), jnp.float32, -bound, bound)
    x = jax.random.normal(k2, (B, N, input_dim), jnp.float32)

    out = logistic_regression_forward(params, x, input_dim, output_dim)
    out = jax.block_until_ready(out)

    ref = reference_forward(params, x, input_dim, output_dim)
    assert out.shape == (B, N, output_dim)
    assert jnp.allclose(out, ref, atol=1e-5, rtol=1e-5)

    print("KERNEL_OK")
</pallas_src>

<mosaic_0001>
module attributes {stable_mosaic.version = 11 : i64} {
  func.func @_logreg_kernel(%arg0: i32, %arg1: memref<1x8x32xf32, #tpu.memory_space<vmem>>, %arg2: memref<1x128x32xf32, #tpu.memory_space<vmem>>, %arg3: memref<1x1x128xf32, #tpu.memory_space<vmem>>, %arg4: memref<1x8x128xf32, #tpu.memory_space<vmem>>) attributes {dimension_semantics = [#tpu.dimension_semantics<parallel>], iteration_bounds = array<i64: 2>, scalar_prefetch = 0 : i64, scratch_operands = 0 : i64, tpu.core_type = #tpu.core_type<tc>, window_params = [{transform_indices = @transform_0, window_bounds = array<i64: 1, 8, 32>}, {transform_indices = @transform_1, window_bounds = array<i64: 1, 128, 32>}, {transform_indices = @transform_2, window_bounds = array<i64: 1, 1, 128>}, {transform_indices = @transform_3, window_bounds = array<i64: 1, 8, 128>}]} {
    %c0 = arith.constant 0 : index
    %c0_0 = arith.constant 0 : index
    %c0_1 = arith.constant 0 : index
    %0 = vector.load %arg1[%c0, %c0_0, %c0_1] : memref<1x8x32xf32, #tpu.memory_space<vmem>>, vector<1x8x32xf32>
    %c0_2 = arith.constant 0 : index
    %c0_3 = arith.constant 0 : index
    %c0_4 = arith.constant 0 : index
    %1 = vector.load %arg2[%c0_2, %c0_3, %c0_4] : memref<1x128x32xf32, #tpu.memory_space<vmem>>, vector<1x128x32xf32>
    "tpu.trace_start"() <{level = 10 : i32, message = "bnd,bod->bno"}> : () -> ()
    %cst = arith.constant dense<0.000000e+00> : vector<1x8x128xf32>
    %2 = tpu.matmul %0, %1, %cst {dimension_numbers = #tpu.dot_dimension_numbers<[2], [2], [1], [1], [0, 0, 0, 1, 1, 1], [0], [0]>} : vector<1x8x32xf32>, vector<1x128x32xf32>, vector<1x8x128xf32> -> vector<1x8x128xf32>
    "tpu.trace_stop"() : () -> ()
    %c0_5 = arith.constant 0 : index
    %c0_6 = arith.constant 0 : index
    %c0_7 = arith.constant 0 : index
    %3 = vector.load %arg3[%c0_5, %c0_6, %c0_7] : memref<1x1x128xf32, #tpu.memory_space<vmem>>, vector<1x1x128xf32>
    %4 = vector.broadcast %3 : vector<1x1x128xf32> to vector<1x8x128xf32>
    %5 = arith.addf %2, %4 : vector<1x8x128xf32>
    %cst_8 = arith.constant 0.000000e+00 : f32
    %6 = vector.broadcast %cst_8 : f32 to vector<1x8x128xf32>
    %7 = arith.subf %6, %5 : vector<1x8x128xf32>
    %8 = math.exp %7 : vector<1x8x128xf32>
    %cst_9 = arith.constant 1.000000e+00 : f32
    %9 = vector.broadcast %cst_9 : f32 to vector<1x8x128xf32>
    %10 = arith.addf %9, %8 : vector<1x8x128xf32>
    %11 = tpu.reciprocal %10 : vector<1x8x128xf32> -> vector<1x8x128xf32>
    %c0_10 = arith.constant 0 : index
    %c0_11 = arith.constant 0 : index
    %c0_12 = arith.constant 0 : index
    %12 = vector.load %arg4[%c0_10, %c0_11, %c0_12] : memref<1x8x128xf32, #tpu.memory_space<vmem>>, vector<1x8x128xf32>
    tpu.vector_store %arg4[%c0_10, %c0_11, %c0_12], %11 {strides = array<i32>} : memref<1x8x128xf32, #tpu.memory_space<vmem>>, vector<1x8x128xf32>,
    return
  }
  func.func @transform_0(%arg0: i32) -> (i32, i32, i32) {
    %c0_i32 = arith.constant 0 : i32
    %c0_i32_0 = arith.constant 0 : i32
    %c0_i32_1 = arith.constant 0 : i32
    return %arg0, %c0_i32, %c0_i32_0 : i32, i32, i32
  }
  func.func @transform_1(%arg0: i32) -> (i32, i32, i32) {
    %c0_i32 = arith.constant 0 : i32
    %c0_i32_0 = arith.constant 0 : i32
    %c0_i32_1 = arith.constant 0 : i32
    return %arg0, %c0_i32, %c0_i32_0 : i32, i32, i32
  }
  func.func @transform_2(%arg0: i32) -> (i32, i32, i32) {
    %c0_i32 = arith.constant 0 : i32
    %c0_i32_0 = arith.constant 0 : i32
    %c0_i32_1 = arith.constant 0 : i32
    return %arg0, %c0_i32, %c0_i32_0 : i32, i32, i32
  }
  func.func @transform_3(%arg0: i32) -> (i32, i32, i32) {
    %c0_i32 = arith.constant 0 : i32
    %c0_i32_0 = arith.constant 0 : i32
    %c0_i32_1 = arith.constant 0 : i32
    return %arg0, %c0_i32, %c0_i32_0 : i32, i32, i32
  }
}

</mosaic_0001>

<bundles_post_ra>
// kernel: tpu_custom_call.1
= control target key start
LH: loop header
LB: loop body
LE: loop exit
PB: predicated region body
PF: predicated region fallthrough
CT: control target
= control target key end

     0   :  { %8 = vsyncpa [#allocation3], 0  ;;  %s702_s0 = inlined_call_operand.vmem [shape: f32[2,8,32], index: 0, kind: input, shape index: {}]   ;;  %s703_s1 = inlined_call_operand.vmem [shape: f32[2,128,32], index: 1, kind: input, shape index: {}]   ;;  %s704_s2 = inlined_call_operand.vmem [shape: f32[2,1,128], index: 2, kind: input, shape index: {}]   ;;  %s705_s3 = inlined_call_operand.hbm [shape: f32[2,8,128], index: 3, kind: output, shape index: {}]  }
   0x1   :  { %10 = vsyncpa [#allocation3 + $0x1], 0  ;;  %s566_s12 = smov 0   ;;  %s568_s13 = smov 0  }
   0x2   :  { %s570_s14 = smov 0   ;;  %s572_s15 = smov 0  }
   0x3 LB: > { %s587_s16 = sadd.s32 4294967295, %s544_s15   ;;  %s408_s17 = sadd.s32 4294967294, %s544_s15   ;;  %s544_s15 = sphi %s572_s15, %s711_s15   ;;  %s540_s14 = sphi %s570_s14, %s710_s14   ;;  %s536_s13 = sphi %s568_s13, %s709_s13   ;;  %s532_s12 = sphi %s566_s12, %s708_s12  }
   0x4   : > { %s591_s18 = sadd.s32 1, %s544_s15   ;;  %s101_s19 = sadd.s32 1, %s540_s14 }
   0x5   : > { %s98_s20 = ssub.s32 %s544_s15, %s591_s18  ;;  %p111_p0 = scmp.ne.s32.totalorder %s540_s14, %s536_s13 }
   0x6   : > { %p99_p1 = scmp.eq.s32.totalorder %s98_s20, 0  ;;  %p112_p2 = scmp.eq.s32.totalorder %s587_s16, 1 }
   0x7   : > { %p117_p3 = scmp.ne.s32.totalorder %s536_s13, %s532_s12  ;;  %p118_p4 = scmp.eq.s32.totalorder %s408_s17, 1 }
   0x8   : > { %s602_s21 = scalar_select %p99_p1, %s540_s14, %s101_s19  }
   0x9   : > { %p604_p5 = por %p112_p2, %p111_p0  ;;  %p608_p6 = por %p118_p4, %p117_p3 }
   0xa   : > { %p411_p7 = scmp.ge.s32.totalorder %s544_s15, 1  ;;  %p157_p8 = scmp.lt.s32.totalorder %s544_s15, 3 }
   0xc   : > { %p158_p9 = pnand %p411_p7, %p157_p8 }
   0xd   : > { %p188_p10 = scmp.lt.s32.totalorder (!%p158_p9), %s587_s16, 1  ;;  %s185_s11 = sand.u32 (!%p158_p9), 1, %s536_s13  }
   0xe   : > { %161 = sbr.rel (%p158_p9) target bundleno = 248 (0xf8), region = 32  ;;  %s412_s17 = sshll.u32 (!%p158_p9), %s185_s11, 3 }
   0xf   : > { %s434_s19 = sshll.u32 (!%p158_p9), %s587_s16, 3  ;;  %s502_s6 = scalar_lea.hbm (!%p158_p9), %s705_s3, 16 }
  0x10   : > { %s323_s26 = scalar_lea.hbm (!%p158_p9), %s705_s3, %s434_s19 }
  0x13   : > { %s616_s24 = scalar_select %p188_p10, %s587_s16, 1  ;;  %vm221_vm0 = vcmask 261120  }
  0x14   : > { %s313_s16 = scalar_lea.sflag [#allocation3], %s185_s11 }
  0x15   : > { %s437_s25 = sshll.u32 %s616_s24, 7  ;;  %s199_s4 = scalar_lea.vmem %s704_s2, %s616_s24 }
  0x16   : > { %s622_s28 = scalar_lea.vmem %s703_s1, %s437_s25  ;;  %s413_s5 = sshll.u32 %s616_s24, 3  ;;  %v477_v17 = vld [vmem:[%s199_s4] ss:$0 sm:$0xff] }
  0x17   : > { %v216_v0 = vld [vmem:[%s622_s28 + $0x78] sm:$0xff]  ;;  %v215_v1 = vld [vmem:[%s622_s28 + $0x70] sm:$0xff]  ;;  %v214_v2 = vld [vmem:[%s622_s28 + $0x68] sm:$0xff]  ;;  %s191_s8 = scalar_lea.vmem %s702_s0, %s413_s5  ;;  %s187_s24 = scalar_lea.vmem [#allocation2], %s412_s17 }
  0x18   : > { %416 = vmatpush.xpose.msk.msra.mxu0 %vm221_vm0, %v216_v0  ;;  %v213_v3 = vld [vmem:[%s622_s28 + $0x60] sm:$0xff]  ;;  %v212_v4 = vld [vmem:[%s622_s28 + $0x58] sm:$0xff]  ;;  %v211_v5 = vld [vmem:[%s622_s28 + $0x50] sm:$0xff]  ;;  %s325_s27 = sshll.u32 %s187_s24, 4  ;;  %s326_s27 = int_to_ptr.vmem [resolvable:$true] %s325_s27 }
  0x19   : > { %v210_v6 = vld [vmem:[%s622_s28 + $0x48] sm:$0xff]  ;;  %v209_v7 = vld [vmem:[%s622_s28 + $0x40] sm:$0xff]  ;;  %v208_v8 = vld [vmem:[%s622_s28 + $0x38] sm:$0xff] }
  0x1a   : > { %v207_v9 = vld [vmem:[%s622_s28 + $0x30] sm:$0xff]  ;;  %v206_v10 = vld [vmem:[%s622_s28 + $0x28] sm:$0xff]  ;;  %v205_v11 = vld [vmem:[%s622_s28 + $0x20] sm:$0xff] }
  0x1b   : > { %v204_v12 = vld [vmem:[%s622_s28 + $0x18] sm:$0xff]  ;;  %v203_v13 = vld [vmem:[%s622_s28 + $0x10] sm:$0xff]  ;;  %v202_v14 = vld [vmem:[%s622_s28 + $0x8] sm:$0xff] }
  0x1c   : > { %417 = vmatpush.xpose.msk.msra.mxu0 %vm221_vm0, %v215_v1  ;;  %v201_v15 = vld [vmem:[%s622_s28] sm:$0xff]  ;;  %s327_s28 = sshll.u32 %s323_s26, 4  ;;  %s328_s28 = int_to_ptr.hbm [resolvable:$true] %s327_s28 }
  0x1d   : > { %v200_v16 = vld [vmem:[%s191_s8] sm:$0xff]  ;;  %s496_s29 = sshra.s32 %s328_s28, 4  ;;  %s497_s29 = int_to_ptr.hbm [resolvable:$true] %s496_s29 }
  0x1e   : > { %s498_s30 = scalar_lea.hbm %s497_s29, 8  ;;  %p503_p0 = scmp.lt.s32.totalorder %s497_s29, %s705_s3 }
  0x1f   : > { %p499_p11 = scmp.ne.s32.totalorder %s497_s29, %s498_s30  ;;  %p504_p1 = scmp.lt.s32.totalorder %s502_s6, %s498_s30 }
  0x20   : > { %418 = vmatpush.xpose.msk.msra.mxu0 %vm221_vm0, %v214_v2 }
  0x21   : > { %p500_p12 = pnand %p499_p11, %p604_p5  ;;  %p505_p2 = por %p504_p1, %p503_p0 }
  0x23   : > { %p501_p13 = pneg %p500_p12 }
  0x24   : > { %419 = vmatpush.xpose.msk.msra.mxu0 %vm221_vm0, %v213_v3 }
  0x25   : > { %p506_p3 = pnand %p505_p2, %p501_p13 }
  0x28   : > { %420 = vmatpush.xpose.msk.msra.mxu0 %vm221_vm0, %v212_v4 }
  0x2c   : > { %421 = vmatpush.xpose.msk.msra.mxu0 %vm221_vm0, %v211_v5 }
  0x30   : > { %422 = vmatpush.xpose.msk.msra.mxu0 %vm221_vm0, %v210_v6 }
  0x34   : > { %423 = vmatpush.xpose.msk.msra.mxu0 %vm221_vm0, %v209_v7 }
  0x38   : > { %424 = vmatpush.xpose.msk.msra.mxu0 %vm221_vm0, %v208_v8 }
  0x3c   : > { %425 = vmatpush.xpose.msk.msra.mxu0 %vm221_vm0, %v207_v9 }
  0x40   : > { %426 = vmatpush.xpose.msk.msra.mxu0 %vm221_vm0, %v206_v10 }
  0x44   : > { %427 = vmatpush.xpose.msk.msra.mxu0 %vm221_vm0, %v205_v11 }
  0x48   : > { %428 = vmatpush.xpose.msk.msra.mxu0 %vm221_vm0, %v204_v12 }
  0x4c   : > { %429 = vmatpush.xpose.msk.msra.mxu0 %vm221_vm0, %v203_v13 }
  0x50   : > { %430 = vmatpush.xpose.msk.msra.mxu0 %vm221_vm0, %v202_v14 }
  0x54   : > { %431 = vmatpush.xpose.msk.msra.mxu0 %vm221_vm0, %v201_v15 }
  0x57   : > { %432 = vmatmul.msk.f32.vlgmr.msra.gmra.mxu0 %vm221_vm0, %v200_v16 }
  0xd4   : > { %v290_v18 = vpop.f32.mrf.mxu0 }
  0xd5   : > { %v291_v19 = vadd.f32 %v477_v17, %v290_v18 }
  0xd7   : > { %v293_v20 = vsub.f32 0.0, %v291_v19 }
  0xd9   : > { %v294_v21 = vmul.f32 1.442695, %v293_v20 }
  0xdb   : > { %478 = vpow2.f32 %v294_v21 }
  0xe1   : > { %v479_v22 = vpop.eup %478 }
  0xe2   : > { %v296_v23 = vadd.f32 1.0, %v479_v22 }
  0xe4   : > { %480 = vrcp.f32 %v296_v23  ;;  %v308_v27 = vand.u32 2147483648, %v296_v23  ;;  %v306_v29 = vand.u32 2147483647, %v296_v23  ;;  %vm302_vm2 = vweird.f32 %v296_v23 }
  0xe6   : > { %v309_v31 = vor.u32 1.1754944e-38, %v308_v27  ;;  %vm307_vm4 = vcmp.eq.f32.partialorder %v306_v29, 8.507059e+37 }
  0xea   : > { %v481_v24 = vpop.eup %480 }
  0xeb   : > { %v298_v25 = vmul.f32 %v481_v24, %v296_v23  ;;  %vm303_vm1 = vweird.f32 %v481_v24 }
  0xec   : > { %vm304_vm3 = vmor %vm302_vm2, %vm303_vm1 }
  0xed   : > { %v299_v26 = vsub.f32 1.0, %v298_v25 }
  0xef   : > { %v300_v28 = vmul.f32 %v481_v24, %v299_v26 }
  0xf1   : > { %v301_v30 = vadd.f32 %v481_v24, %v300_v28 }
  0xf3   : > { %v305_v32 = vsel %vm304_vm3, %v481_v24, %v301_v30 }
  0xf4   : > { %v310_v33 = vsel %vm307_vm4, %v309_v31, %v305_v32 }
  0xf5   : > { %311 = vst [vmem:[%s187_s24] sm:$0xff] %v310_v33 }
  0xf6   : > { %509 = shalt.err (!%p506_p3)
}
  0xf7   : > { %438 = dma.vmem_to_hbm [thread:$0]  (%p604_p5), %s326_s27, 128, %s328_s28, %s313_s16  }
  0xf8 PF: > { %p444_p4 = scmp.ge.s32.totalorder %s544_s15, 2  ;;  %s339_s9 = sand.u32 1, %s532_s12  }
  0xf9   : > { %s340_s10 = scalar_lea.sflag [#allocation3], %s339_s9 }
  0xfa   : > { %p441_p7 = pnand %p444_p4, %p608_p6 }
  0xfc   : > { %p442_p8 = pneg %p441_p7 }
  0xfe   : > { %527 = dma.done.wait (%p442_p8), %s340_s10, 128  }
  0xff   : > { %529 = vsyncadd (%p442_p8), %s340_s10, 4294967168  ;;  %p13_p9 = scmp.ge.s32.totalorder %s591_s18, 4   ;;  %s708_s12 = smov %s536_s13 }
 0x100   : > { %s709_s13 = smov %s540_s14  ;;  %s710_s14 = smov %s602_s21 }
 0x101   : > { %s711_s15 = smov %s591_s18  ;;  %15 = sbr.rel (!%p13_p9) target bundleno = 3 (0x3), region = 73 }
 0x106   :  { %346 = vsyncpa [#allocation3], 1 }
 0x107   :  { %348 = vsyncpa [#allocation3 + $0x1], 1 }

</bundles_post_ra>
